<compile_context>
chip_gen: v6e
topology: v6e:2x2x1
jax: 0.10.0
libtpu: 0.0.40
codegen_flags: <defaults>
</compile_context>

<pallas_src>
import jax
import jax.numpy as jnp
from jax.experimental import pallas as pl
from jax.experimental.pallas import tpu as pltpu


# ----------------------------- Pallas kernel -------------------------------

def _conv1x1_kernel(x_ref, w_ref, b_ref, o_ref):
    # x_ref: (1, Cin, T)  bf16 pixel tile (pixels on the lane axis)
    # w_ref: (Cout, Cin)  bf16 full weight (constant index_map -> stays resident)
    # b_ref: (Cout, 1)    f32  full bias
    # o_ref: (1, Cout, T) f32  output tile (T is a multiple of 128 -> lane-dense)
    acc = jnp.dot(w_ref[...], x_ref[0],
                  preferred_element_type=jnp.float32)        # MXU, f32 accum
    o_ref[0] = (acc + b_ref[...]).astype(o_ref.dtype)        # f32 epilogue


def conv1x1_pallas(x_nchw, weight, bias, *, target_tile=8192):
    """1x1 conv as W @ x with pixels on the lane axis.

    x_nchw: (N, Cin, H, W) float; cast to bf16 for the MXU / halved HBM read.
    weight: (Cout, Cin)    -- Conv2d 1x1 weight with the 1x1 dims squeezed.
    bias:   (Cout,)
    returns (N, Cout, H, W) float32
    """
    N, Cin, H, W = x_nchw.shape
    Cout = weight.shape[0]
    HW = H * W

    # bf16 operands feed the MXU natively and halve the dominant x read.
    # (In a real pipeline the producer would emit bf16 directly; this cast is
    # a one-time conversion here.)
    x = x_nchw.reshape(N, Cin, HW).astype(jnp.bfloat16)
    w = weight.astype(jnp.bfloat16)
    b = bias.astype(jnp.float32).reshape(Cout, 1)

    # Lane-dense pixel tile: multiple of 128, as large as is useful.  At
    # tile=8192: x block 512 KiB (bf16) + y block 1.5 MiB (f32), double
    # buffered ~4 MiB -> fits comfortably on v5e/v6e (128 MiB) and v7x (64 MiB).
    hw128 = pl.cdiv(HW, 128) * 128
    tile = min(target_tile, hw128)
    hw_pad = pl.cdiv(HW, tile) * tile
    if hw_pad != HW:
        x = jnp.pad(x, ((0, 0), (0, 0), (0, hw_pad - HW)))

    grid = (N, hw_pad // tile)

    cost = pl.CostEstimate(
        flops=2 * N * HW * Cin * Cout,
        transcendentals=0,
        bytes_accessed=(x.size * 2              # bf16 activations
                        + N * hw_pad * Cout * 4  # f32 output
                        + w.size * 2 + Cout * 4),
    )

    y = pl.pallas_call(
        _conv1x1_kernel,
        out_shape=jax.ShapeDtypeStruct((N, Cout, hw_pad), jnp.float32),
        grid_spec=pltpu.PrefetchScalarGridSpec(
            num_scalar_prefetch=0,
            grid=grid,
            in_specs=[
                pl.BlockSpec((1, Cin, tile), lambda n, i: (n, 0, i)),
                pl.BlockSpec((Cout, Cin), lambda n, i: (0, 0)),
                pl.BlockSpec((Cout, 1), lambda n, i: (0, 0)),
            ],
            out_specs=pl.BlockSpec((1, Cout, tile), lambda n, i: (n, 0, i)),
        ),
        compiler_params=pltpu.CompilerParams(
            dimension_semantics=("parallel", "parallel")),
        cost_estimate=cost,
    )(x, w, b)

    if hw_pad != HW:
        y = y[:, :, :HW]
    return y.reshape(N, Cout, H, W)


# ----------------------------- Module wrapper -------------------------------

def pixel_shuffle(x, r):
    # x: (N, C*r*r, H, W) -> (N, C, H*r, W*r), matching torch.nn.PixelShuffle
    N, Crr, H, W = x.shape
    C = Crr // (r * r)
    x = x.reshape(N, C, r, r, H, W)
    x = jnp.transpose(x, (0, 1, 4, 2, 5, 3))   # (N, C, H, r, W, r)
    return x.reshape(N, C, H * r, W * r)


def patch_unembed_forward(x, weight, bias, *, patch_size=4):
    """PatchUnEmbed forward.

    x:      (N, embed_dim, H, W)  NCHW
    weight: (out_chans*patch_size**2, embed_dim)  -- Conv2d 1x1 weight, squeezed
    bias:   (out_chans*patch_size**2,)
    returns (N, out_chans, H*patch_size, W*patch_size) float32
    """
    # TODO(synk): only kernel_size=1 (the module's default) is implemented; a
    # general kernel_size with reflect padding is not a 1x1 matmul.
    y = conv1x1_pallas(x, weight, bias)          # (N, Cout, H, W) -- no transposes
    # TODO(synk): pixel-shuffle stays as pure-JAX layout glue; folding it into
    # the output index_map would need a per-(r,r) interleaved store pattern.
    return pixel_shuffle(y, patch_size)


# ----------------------------------- main -----------------------------------

if __name__ == "__main__":
    patch_size = 4
    out_chans = 3
    embed_dim = 32
    N, H, W = 2, 16, 16
    Cout = out_chans * patch_size ** 2    # 48

    key = jax.random.PRNGKey(0)
    kx, kw, kb = jax.random.split(key, 3)

    x = jax.random.normal(kx, (N, embed_dim, H, W), dtype=jnp.float32)
    weight = jax.random.normal(kw, (Cout, embed_dim), dtype=jnp.float32) * 0.05
    bias = jax.random.normal(kb, (Cout,), dtype=jnp.float32) * 0.05

    out = patch_unembed_forward(x, weight, bias, patch_size=patch_size)
    out = jax.block_until_ready(out)

    # sanity: shape + cross-check against a pure-JAX reference that uses the
    # same bf16-rounded operands (kernel accumulates in f32).
    assert out.shape == (N, out_chans, H * patch_size, W * patch_size), out.shape
    xb = x.astype(jnp.bfloat16).astype(jnp.float32)
    wb = weight.astype(jnp.bfloat16).astype(jnp.float32)
    ref = jnp.einsum('oc,nchw->nohw', wb, xb) + bias[None, :, None, None]
    ref = pixel_shuffle(ref, patch_size)
    assert jnp.allclose(out, ref, atol=2e-3, rtol=2e-3), float(
        jnp.max(jnp.abs(out - ref)))

    print("KERNEL_OK")
</pallas_src>

<mosaic_0001>
module attributes {stable_mosaic.version = 11 : i64} {
  func.func @_conv1x1_kernel(%arg0: i32, %arg1: i32, %arg2: memref<1x32x256xbf16, #tpu.memory_space<vmem>>, %arg3: memref<48x32xbf16, #tpu.memory_space<vmem>>, %arg4: memref<48x1xf32, #tpu.memory_space<vmem>>, %arg5: memref<1x48x256xf32, #tpu.memory_space<vmem>>) attributes {dimension_semantics = [#tpu.dimension_semantics<parallel>, #tpu.dimension_semantics<parallel>], iteration_bounds = array<i64: 2, 1>, scalar_prefetch = 0 : i64, scratch_operands = 0 : i64, tpu.core_type = #tpu.core_type<tc>, window_params = [{transform_indices = @transform_0, window_bounds = array<i64: 1, 32, 256>}, {pipeline_mode = #tpu.pipeline_mode<synchronous>, transform_indices = @transform_1, window_bounds = array<i64: 48, 32>}, {pipeline_mode = #tpu.pipeline_mode<synchronous>, transform_indices = @transform_2, window_bounds = array<i64: 48, 1>}, {transform_indices = @transform_3, window_bounds = array<i64: 1, 48, 256>}]} {
    %c0 = arith.constant 0 : index
    %c0_0 = arith.constant 0 : index
    %0 = vector.load %arg3[%c0, %c0_0] : memref<48x32xbf16, #tpu.memory_space<vmem>>, vector<48x32xbf16>
    %c0_1 = arith.constant 0 : index
    %c0_2 = arith.constant 0 : index
    %c0_3 = arith.constant 0 : index
    %1 = vector.load %arg2[%c0_1, %c0_2, %c0_3] : memref<1x32x256xbf16, #tpu.memory_space<vmem>>, vector<1x32x256xbf16>
    %2 = vector.shape_cast %1 : vector<1x32x256xbf16> to vector<32x256xbf16>
    %cst = arith.constant dense<0.000000e+00> : vector<48x256xf32>
    %3 = tpu.matmul %0, %2, %cst {dimension_numbers = #tpu.dot_dimension_numbers<[1], [0], [0], [1], [0, 0, 1, 1], [], []>} : vector<48x32xbf16>, vector<32x256xbf16>, vector<48x256xf32> -> vector<48x256xf32>
    %c0_4 = arith.constant 0 : index
    %c0_5 = arith.constant 0 : index
    %4 = vector.load %arg4[%c0_4, %c0_5] : memref<48x1xf32, #tpu.memory_space<vmem>>, vector<48x1xf32>
    %5 = vector.broadcast %4 : vector<48x1xf32> to vector<48x256xf32>
    %6 = arith.addf %3, %5 : vector<48x256xf32>
    %c0_6 = arith.constant 0 : index
    %c0_7 = arith.constant 0 : index
    %c0_8 = arith.constant 0 : index
    %7 = vector.load %arg5[%c0_6, %c0_7, %c0_8] : memref<1x48x256xf32, #tpu.memory_space<vmem>>, vector<1x48x256xf32>
    %8 = vector.shape_cast %7 : vector<1x48x256xf32> to vector<48x256xf32>
    %9 = vector.shape_cast %6 : vector<48x256xf32> to vector<1x48x256xf32>
    tpu.vector_store %arg5[%c0_6, %c0_7, %c0_8], %9 {strides = array<i32>} : memref<1x48x256xf32, #tpu.memory_space<vmem>>, vector<1x48x256xf32>,
    return
  }
  func.func @transform_0(%arg0: i32, %arg1: i32) -> (i32, i32, i32) {
    %c0_i32 = arith.constant 0 : i32
    %c0_i32_0 = arith.constant 0 : i32
    return %arg0, %c0_i32, %arg1 : i32, i32, i32
  }
  func.func @transform_1(%arg0: i32, %arg1: i32) -> (i32, i32) {
    %c0_i32 = arith.constant 0 : i32
    %c0_i32_0 = arith.constant 0 : i32
    %c0_i32_1 = arith.constant 0 : i32
    return %c0_i32, %c0_i32_0 : i32, i32
  }
  func.func @transform_2(%arg0: i32, %arg1: i32) -> (i32, i32) {
    %c0_i32 = arith.constant 0 : i32
    %c0_i32_0 = arith.constant 0 : i32
    %c0_i32_1 = arith.constant 0 : i32
    return %c0_i32, %c0_i32_0 : i32, i32
  }
  func.func @transform_3(%arg0: i32, %arg1: i32) -> (i32, i32, i32) {
    %c0_i32 = arith.constant 0 : i32
    %c0_i32_0 = arith.constant 0 : i32
    return %arg0, %c0_i32, %arg1 : i32, i32, i32
  }
}

</mosaic_0001>

<bundles_post_ra>
// kernel: tpu_custom_call.1
= control target key start
LH: loop header
LB: loop body
LE: loop exit
PB: predicated region body
PF: predicated region fallthrough
CT: control target
= control target key end

     0   :  { %8 = vsyncpa [#allocation3], 0  ;;  %s820_s0 = inlined_call_operand.vmem [shape: bf16[2,32,256], index: 0, kind: input, shape index: {}]   ;;  %s821_s1 = inlined_call_operand.vmem [shape: bf16[48,32], index: 1, kind: input, shape index: {}]   ;;  %s822_s2 = inlined_call_operand.vmem [shape: f32[48,1], index: 2, kind: input, shape index: {}]   ;;  %s823_s3 = inlined_call_operand.hbm [shape: f32[2,48,256], index: 3, kind: output, shape index: {}]  }
   0x1   :  { %10 = vsyncpa [#allocation3 + $0x1], 0  ;;  %s660_s12 = smov 0   ;;  %s662_s13 = smov 0  }
   0x2   :  { %s664_s14 = smov 0   ;;  %s666_s15 = smov 0  }
   0x3   :  { %s668_s16 = smov 0   ;;  %s670_s17 = smov 0  }
   0x4 LB: > { %s462_s18 = sadd.s32 4294967295, %s634_s17   ;;  %s463_s19 = sadd.s32 4294967294, %s634_s17   ;;  %s634_s17 = sphi %s670_s17, %s16_s17   ;;  %s630_s16 = sphi %s668_s16, %s830_s16   ;;  %s626_s15 = sphi %s666_s15, %s829_s15   ;;  %s622_s14 = sphi %s664_s14, %s828_s14   ;;  %s618_s13 = sphi %s662_s13, %s827_s13   ;;  %s614_s12 = sphi %s660_s12, %s826_s12  }
   0x5   : > { %s28_s20 = sadd.s32 1, %s630_s16  ;;  %s107_s21 = sadd.s32 1, %s622_s14 }
   0x6   : > { %p30_p0 = scmp.ge.s32.totalorder %s28_s20, 2  ;;  %p117_p1 = scmp.ne.s32.totalorder %s622_s14, %s618_s13 }
   0x7   : > { %p118_p2 = scmp.eq.s32.totalorder %s462_s18, 1  ;;  %p123_p3 = scmp.ne.s32.totalorder %s618_s13, %s614_s12 }
   0x8   : > { %s832_s20 = smov (%p30_p0, %s28_s20), 0  ;;  %p124_p5 = scmp.eq.s32.totalorder %s463_s19, 1 }
   0x9   : > { %p700_p4 = por %p118_p2, %p117_p1  ;;  %s102_s23 = ssub.s32 %s630_s16, %s832_s20 }
   0xa   : > { %p466_p6 = scmp.ge.s32.totalorder %s634_s17, 1  ;;  %p105_p7 = scmp.eq.s32.totalorder %s102_s23, 0 }
   0xb   : > { %p707_p8 = por %p124_p5, %p123_p3  ;;  %p161_p9 = scmp.lt.s32.totalorder %s634_s17, 3 }
   0xc   : > { %s713_s25 = scalar_select %p105_p7, %s622_s14, %s107_s21  }
   0xd   : > { %p162_p10 = pnand %p466_p6, %p161_p9 }
   0xe   : > { %p190_p11 = scmp.lt.s32.totalorder (!%p162_p10), %s626_s15, 1  ;;  %s186_s5 = sand.u32 (!%p162_p10), 1, %s618_s13  }
   0xf   : > { %165 = sbr.rel (%p162_p10) target bundleno = 256 (0x100), region = 32  ;;  %s637_s21 = smov (!%p162_p10), [#allocation2]  }
  0x10   : > { %s487_s6 = smul.u32 (!%p162_p10), 96, %s186_s5  ;;  %s562_s23 = sshll.u32 (!%p162_p10), %s637_s21, 4  ;;  %s563_s23 = int_to_ptr.vmem [resolvable:$false] %s562_s23 }
  0x11   : > { %s488_s8 = smul.u32 (!%p162_p10), 1536, %s626_s15 }
  0x13   : > { %s767_s18 = scalar_lea.hbm (!%p162_p10), %s823_s3, %s488_s8 }
  0x14   : > { %v636_v0 = vmov 0   ;;  %s191_s26 = scalar_select %p190_p11, %s626_s15, 1  ;;  %v213_v1 = vld [vmem:[%s822_s2 + $0x10] sm:$0xff]  ;;  %v211_v2 = vld [vmem:[%s822_s2] sm:$0xff]  ;;  %v214_v6 = vld [vmem:[%s822_s2 + $0x18] sm:$0xff]  ;;  %vm282_vm0 = vcmask 261120  }
  0x15   : > { %324 = vmatprep.mubr.bf16.mxu0 %v636_v0  ;;  %334 = vmatprep.mubr.bf16.mxu1 %v636_v0  ;;  %v212_v7 = vld [vmem:[%s822_s2 + $0x8] sm:$0xff]  ;;  %v555_v9 = vld [vmem:[%s821_s1] sm:$0xff]   ;;  %v557_v13 = vld [vmem:[%s821_s1 + $0x10] sm:$0xff]   ;;  %s775_s15 = scalar_lea.sflag [#allocation3], %s186_s5 }
  0x16   : > { %548 = vset.pattern.permute.xlu1 %v636_v0  ;;  %547 = vset.pattern.permute.xlu0 %v636_v0  ;;  %s482_s4 = sshll.u32 %s191_s26, 5  ;;  %v556_v10 = vld [vmem:[%s821_s1 + $0x8] sm:$0xff]   ;;  %v215_v12 = vld [vmem:[%s822_s2 + $0x20] sm:$0xff]  ;;  %s564_s26 = scalar_lea.vmem %s563_s23, 3072 }
  0x17   : > { %229 = vperm.xlu1 %548, %v213_v1   ;;  %219 = vperm.xlu0 %547, %v211_v2   ;;  %s197_s7 = scalar_lea.vmem %s820_s0, %s482_s4  ;;  %v216_v11 = vld [vmem:[%s822_s2 + $0x28] sm:$0xff] }
  0x18   : > { %v549_v3 = vld [vmem:[%s197_s7 + $0x14] ss:$8 sps:$4 sm:$0xff]   ;;  %v551_v4 = vld [vmem:[%s197_s7 + $0x10] ss:$8 sps:$4 sm:$0xff]   ;;  %v552_v5 = vld [vmem:[%s197_s7 + $0x4] ss:$8 sps:$4 sm:$0xff]  }
  0x19   : > { %304 = vmatprep.subr.bf16.mxu0 %v549_v3  ;;  %483 = vmatprep.subr.bf16.mxu1 %v549_v3  ;;  %v554_v8 = vld [vmem:[%s197_s7] ss:$8 sps:$4 sm:$0xff]   ;;  %s750_s7 = scalar_lea.vmem [#allocation2], %s487_s6 }
  0x1a   : > { %305 = vmatpush1.bf16.msra.mxu0 %v551_v4  ;;  %485 = vmatpush1.bf16.msra.mxu1 %v551_v4  ;;  %s383_s9 = sshll.u32 %s750_s7, 4  ;;  %s769_s9 = int_to_ptr.vmem [resolvable:$true] %s383_s9 }
  0x1b   : > { %306 = vmatprep.subr.bf16.mxu0 %v552_v5  ;;  %484 = vmatprep.subr.bf16.mxu1 %v552_v5  ;;  %s558_s19 = scalar_lea.vmem %s769_s9, 1536  ;;  %p565_p1 = scmp.lt.s32.totalorder %s769_s9, %s563_s23 }
  0x1c   : > { %234 = vperm.xlu1 %548, %v214_v6   ;;  %224 = vperm.xlu0 %547, %v212_v7   ;;  %p559_p12 = scmp.ne.s32.totalorder %s769_s9, %s558_s19  ;;  %p566_p2 = scmp.lt.s32.totalorder %s564_s26, %s558_s19 }
  0x1e   : > { %307 = vmatpush1.bf16.msra.mxu0 %v554_v8  ;;  %486 = vmatpush1.bf16.msra.mxu1 %v554_v8  ;;  %p560_p13 = pnand %p559_p12, %p700_p4  ;;  %p567_p3 = por %p566_p2, %p565_p1 }
  0x20   : > { %244 = vperm.xlu1 %548, %v216_v11   ;;  %239 = vperm.xlu0 %547, %v215_v12   ;;  %p561_p0 = pneg %p560_p13 }
  0x21   : > { %476 = vmatmul.mubr.msk.bf16.vlgmr.msra.gmra.mxu0 %vm282_vm0, %v555_v9  ;;  %477 = vmatmul.mubr.msk.bf16.vlgmr.msra.gmra.mxu1 %vm282_vm0, %v556_v10 }
  0x22   : > { %344 = vmatprep.mubr.bf16.mxu1 %v636_v0  ;;  %p568_p5 = pnand %p567_p3, %p561_p0 }
  0x29   : > { %478 = vmatmul.mubr.msk.bf16.gmra.mxu1 %vm282_vm0, %v557_v13 }
  0x92   : > { %v220_v14 = vpop.permute.xlu0 %219  ;;  %v230_v15 = vpop.permute.xlu1 %229 }
  0x97   : > { %v225_v20 = vpop.permute.xlu0 %224  ;;  %v235_v23 = vpop.permute.xlu1 %234 }
  0x9b   : > { %v240_v34 = vpop.permute.xlu0 %239  ;;  %v245_v39 = vpop.permute.xlu1 %244 }
  0xe1   : > { %v326_v16 = vpop.f32.mrf.mxu0  ;;  %v336_v17 = vpop.f32.mrf.mxu1 }
  0xe2   : > { %v327_v18 = vadd.f32 %v326_v16, %v220_v14  ;;  %v337_v19 = vadd.f32 %v336_v17, %v230_v15 }
  0xe3   : > { %v328_v21 = vpop.f32.mrf.mxu0  ;;  %v338_v22 = vpop.f32.mrf.mxu1 }
  0xe4   : > { %355 = vst [vmem:[%s750_s7] sm:$0xff] %v327_v18  ;;  %359 = vst [vmem:[%s750_s7 + $0x20] sm:$0xff] %v337_v19  ;;  %v329_v24 = vadd.f32 %v328_v21, %v220_v14  ;;  %v339_v25 = vadd.f32 %v338_v22, %v230_v15 }
  0xe5   : > { %v330_v26 = vpop.f32.mrf.mxu0  ;;  %v340_v27 = vpop.f32.mrf.mxu1 }
  0xe6   : > { %356 = vst [vmem:[%s750_s7 + $0x8] sm:$0xff] %v329_v24  ;;  %360 = vst [vmem:[%s750_s7 + $0x28] sm:$0xff] %v339_v25  ;;  %v331_v28 = vadd.f32 %v330_v26, %v225_v20  ;;  %v341_v29 = vadd.f32 %v340_v27, %v235_v23 }
  0xe7   : > { %v332_v30 = vpop.f32.mrf.mxu0  ;;  %v342_v31 = vpop.f32.mrf.mxu1 }
  0xe8   : > { %357 = vst [vmem:[%s750_s7 + $0x10] sm:$0xff] %v331_v28  ;;  %361 = vst [vmem:[%s750_s7 + $0x30] sm:$0xff] %v341_v29  ;;  %v333_v32 = vadd.f32 %v332_v30, %v225_v20  ;;  %v343_v33 = vadd.f32 %v342_v31, %v235_v23 }
  0xe9   : > { %v346_v35 = vpop.f32.mrf.mxu1 }
  0xea   : > { %358 = vst [vmem:[%s750_s7 + $0x18] sm:$0xff] %v333_v32  ;;  %362 = vst [vmem:[%s750_s7 + $0x38] sm:$0xff] %v343_v33  ;;  %v347_v36 = vadd.f32 %v346_v35, %v240_v34 }
  0xeb   : > { %v348_v37 = vpop.f32.mrf.mxu1 }
  0xec   : > { %363 = vst [vmem:[%s750_s7 + $0x40] sm:$0xff] %v347_v36  ;;  %v349_v38 = vadd.f32 %v348_v37, %v240_v34 }
  0xed   : > { %v350_v40 = vpop.f32.mrf.mxu1 }
  0xee   : > { %364 = vst [vmem:[%s750_s7 + $0x48] sm:$0xff] %v349_v38  ;;  %v351_v41 = vadd.f32 %v350_v40, %v245_v39 }
  0xef   : > { %v352_v42 = vpop.f32.mrf.mxu1 }
  0xf0   : > { %365 = vst [vmem:[%s750_s7 + $0x50] sm:$0xff] %v351_v41  ;;  %v353_v43 = vadd.f32 %v352_v42, %v245_v39 }
  0xf2   : > { %366 = vst [vmem:[%s750_s7 + $0x58] sm:$0xff] %v353_v43 }
  0xf3   : > { %571 = shalt.err (!%p568_p5)
}
  0xf4   : > { %s572_s27 = scalar_lea.hbm %s767_s18, 1536  ;;  %s576_s30 = scalar_lea.hbm %s823_s3, 3072 }
  0xf5   : > { %p573_p6 = scmp.ne.s32.totalorder %s767_s18, %s572_s27  ;;  %p577_p10 = scmp.lt.s32.totalorder %s767_s18, %s823_s3 }
  0xf6   : > { %p578_p11 = scmp.lt.s32.totalorder %s576_s30, %s572_s27 }
  0xf7   : > { %p574_p7 = pnand %p573_p6, %p700_p4 }
  0xf8   : > { %p579_p12 = por %p578_p11, %p577_p10 }
  0xf9   : > { %p575_p9 = pneg %p574_p7 }
  0xfb   : > { %p580_p13 = pnand %p579_p12, %p575_p9 }
  0xfd   : > { %583 = shalt.err (!%p580_p13)
}
  0xfe   : > { %s638_s6 = smov 256   ;;  %s639_s7 = smov 16  }
  0xff   : > { %489 = dma.vmem_to_hbm [thread:$0]  (%p700_p4), %s769_s9, 1536, %s767_s18, %s775_s15, %s638_s6, %s638_s6, %s639_s7  }
 0x100 PF: > { %p495_p0 = scmp.ge.s32.totalorder %s634_s17, 2  ;;  %s398_s8 = sand.u32 1, %s614_s12  }
 0x101   : > { %s399_s10 = scalar_lea.sflag [#allocation3], %s398_s8 }
 0x102   : > { %p492_p1 = pnand %p495_p0, %p707_p8 }
 0x104   : > { %p493_p2 = pneg %p492_p1 }
 0x106   : > { %609 = dma.done.wait (%p493_p2), %s399_s10, 1536  }
 0x107   : > { %611 = vsyncadd (%p493_p2), %s399_s10, 4294965760  ;;  %s16_s17 = sadd.s32 1, %s634_s17   ;;  %s826_s12 = smov %s618_s13 }
 0x108   : > { %p13_p3 = scmp.ge.s32.totalorder %s16_s17, 4   ;;  %s827_s13 = smov %s622_s14 }
 0x109   : > { %s828_s14 = smov %s713_s25  ;;  %s829_s15 = smov %s630_s16 }
 0x10a   : > { %s830_s16 = smov %s832_s20  ;;  %15 = sbr.rel (!%p13_p3) target bundleno = 4 (0x4), region = 67 }
 0x10f   :  { %404 = vsyncpa [#allocation3], 1 }
 0x110   :  { %406 = vsyncpa [#allocation3 + $0x1], 1 }

</bundles_post_ra>
